<compile_context>
chip_gen: v7x
topology: tpu7x:2x2x1
jax: 0.10.0
libtpu: 0.0.40
codegen_flags: <defaults>
</compile_context>

<pallas_src>
import functools

import jax
import jax.numpy as jnp
from jax import lax
from jax.experimental import pallas as pl
from jax.experimental.pallas import tpu as pltpu


def _round_up(v, mult):
    return -(-v // mult) * mult


def _fused_mlp_kernel(x_ref, *refs, n_layers, chunk_rows, num_chunks,
                      lane_dense_out, matmul_dtype):
    """Whole MLP in one kernel body; intermediates live in vregs.

    refs = (w1, b1, w2, b2, ..., wL, bL, o_ref).  If lane_dense_out, the last
    weight arrives pre-transposed as (1, K) and o_ref is a (1, 1, tm) block.
    """
    o_ref = refs[-1]
    wb = refs[:-1]

    # Weights/biases are tiny (<~20 KB total): load once, resident across the
    # whole tile / chunk loop.
    ws = [wb[2 * i][...] for i in range(n_layers)]
    bs = [wb[2 * i + 1][...] for i in range(n_layers)]

    def run_chunk(r0, rows):
        h = x_ref[pl.ds(r0, rows), :]
        for li in range(n_layers - 1):
            # MXU matmul (optionally bf16 operands); bias/ReLU stay f32
            # (v5e VPU has no bf16 path).
            h = jnp.dot(h.astype(matmul_dtype), ws[li].astype(matmul_dtype),
                        preferred_element_type=jnp.float32) + bs[li]
            h = jnp.maximum(h, 0.0)

        w_last, b_last = ws[-1], bs[-1]
        if lane_dense_out:
            # Final (K -> 1) layer: weight is (1, K); contract K-vs-K
            # (trans-B dot_general) so the result is already lane-dense
            # (1, rows) -> unmasked store into the (1, 1, tm) output block.
            y = lax.dot_general(
                w_last.astype(matmul_dtype), h.astype(matmul_dtype),
                (((1,), (1,)), ((), ())),
                preferred_element_type=jnp.float32)
            y = jax.nn.sigmoid(y + b_last)            # b_last is (1, 1)
            o_ref[0, :, pl.ds(r0, rows)] = y.astype(o_ref.dtype)
        else:
            y = jnp.dot(h.astype(matmul_dtype), w_last.astype(matmul_dtype),
                        preferred_element_type=jnp.float32) + b_last
            y = jax.nn.sigmoid(y)
            o_ref[pl.ds(r0, rows), :] = y.astype(o_ref.dtype)

    if num_chunks == 1:
        run_chunk(0, chunk_rows)                      # chunk_rows == tm
    else:
        def body(c, carry):
            r0 = pl.multiple_of(c * chunk_rows, chunk_rows)
            run_chunk(r0, chunk_rows)
            return carry
        lax.fori_loop(0, num_chunks, body, 0)


def mlp_wad_forward(params, x, *, block_m=2048, chunk_rows=128,
                    matmul_dtype=jnp.float32):
    """Fused forward pass: one pallas_call for the whole MLP.

    params: list of (w, b) with w (in, out) and b (1, out), float32.
    x: (M, input_size) float32.  Returns (M, output_size) float32.
    """
    m, k_in = x.shape
    n_layers = len(params)
    out_dim = params[-1][0].shape[1]
    lane_dense_out = out_dim == 1

    # Flatten params; pre-transpose the last weight for the lane-dense path.
    flat = []
    for li, (w, b) in enumerate(params):
        if li == n_layers - 1 and lane_dense_out:
            flat.append(w.T)                           # (1, K)
        else:
            flat.append(w)
        flat.append(b)

    # ---- batch tiling ------------------------------------------------------
    # chunk offsets index the lane dim of the lane-dense output, so keep them
    # 128-aligned; block_m is a multiple of chunk_rows.
    chunk_rows = max(128, _round_up(chunk_rows, 128))
    if m <= block_m:
        tm = m                                         # single full block
        tile_chunk, num_chunks = tm, 1
    else:
        tm = max(chunk_rows, (block_m // chunk_rows) * chunk_rows)
        tile_chunk, num_chunks = chunk_rows, tm // chunk_rows
    grid_m = pl.cdiv(m, tm)                            # partial edge block OK

    in_specs = [pl.BlockSpec((tm, k_in), lambda i: (i, 0))]
    for a in flat:
        # Weights/biases: full-array blocks, resident in VMEM across the grid.
        in_specs.append(pl.BlockSpec(a.shape, lambda i: (0, 0)))

    if lane_dense_out:
        out_shape = jax.ShapeDtypeStruct((grid_m, 1, tm), x.dtype)
        out_specs = pl.BlockSpec((1, 1, tm), lambda i: (i, 0, 0))
    else:
        out_shape = jax.ShapeDtypeStruct((m, out_dim), x.dtype)
        out_specs = pl.BlockSpec((tm, out_dim), lambda i: (i, 0))

    # Advisory cost estimate so XLA can overlap neighbours with this kernel.
    flops = sum(2 * m * w.shape[0] * w.shape[1] + m * w.shape[1]
                for w, _ in params)
    bytes_accessed = (x.size * x.dtype.itemsize
                      + sum(int(a.size) * 4 for a in flat)
                      + m * out_dim * 4)
    cost = pl.CostEstimate(flops=int(flops), transcendentals=int(m * out_dim),
                           bytes_accessed=int(bytes_accessed))

    # VMEM estimate (x block is lane-padded to 128 lanes, double-buffered).
    x_blk_bytes = tm * _round_up(k_in, 128) * 4
    out_blk_bytes = (_round_up(tm, 128) if lane_dense_out
                     else tm * _round_up(out_dim, 128)) * 4
    param_bytes = sum(int(a.size) * 4 for a in flat)
    vmem_est = 2 * (x_blk_bytes + out_blk_bytes) + 2 * param_bytes + (2 << 20)
    vmem_limit = (int(min(vmem_est + (4 << 20), 48 * 1024 * 1024))
                  if vmem_est > (14 << 20) else None)

    kernel = functools.partial(
        _fused_mlp_kernel,
        n_layers=n_layers,
        chunk_rows=tile_chunk,
        num_chunks=num_chunks,
        lane_dense_out=lane_dense_out,
        matmul_dtype=matmul_dtype,
    )

    y = pl.pallas_call(
        kernel,
        out_shape=out_shape,
        grid=(grid_m,),
        in_specs=in_specs,
        out_specs=out_specs,
        compiler_params=pltpu.CompilerParams(
            dimension_semantics=("parallel",),
            vmem_limit_bytes=vmem_limit,
        ),
        cost_estimate=cost,
    )(x, *flat)

    if lane_dense_out:
        # (grid_m, 1, tm) -> (M, 1); trailing garbage rows (partial edge block)
        # are sliced off here.
        return y.reshape(-1)[:m].reshape(m, 1)
    return y


def init_mlp_wad_params(key, input_size, layer_sizes, output_size):
    """Deterministic params mirroring nn.Linear default init (uniform ±1/sqrt(fan_in))."""
    dims = [input_size] + list(layer_sizes) + [output_size]
    params = []
    for li in range(len(dims) - 1):
        fan_in, fan_out = dims[li], dims[li + 1]
        key, kw, kb = jax.random.split(key, 3)
        bound = 1.0 / (fan_in ** 0.5)
        w = jax.random.uniform(
            kw, (fan_in, fan_out), jnp.float32, minval=-bound, maxval=bound
        )
        b = jax.random.uniform(
            kb, (1, fan_out), jnp.float32, minval=-bound, maxval=bound
        )
        params.append((w, b))
    return params


def mlp_wad_reference(params, x):
    """Pure-JAX reference for correctness check."""
    y = x
    n_layers = len(params)
    for li, (w, b) in enumerate(params):
        y = y @ w + b
        y = jax.nn.sigmoid(y) if li == n_layers - 1 else jnp.maximum(y, 0.0)
    return y


if __name__ == "__main__":
    # Small configuration consistent with the module's constructor.
    input_size = 32
    layer_sizes = [64, 32]
    output_size = 1

    key = jax.random.PRNGKey(0)
    key, kx = jax.random.split(key)
    params = init_mlp_wad_params(key, input_size, layer_sizes, output_size)

    # 1) Small-batch check (single full block path), exact f32 parity.
    batch = 8
    x = jax.random.normal(kx, (batch, input_size), jnp.float32)
    out = jax.block_until_ready(mlp_wad_forward(params, x))
    ref = mlp_wad_reference(params, x)
    assert out.shape == (batch, output_size)
    assert jnp.allclose(out, ref, atol=1e-5, rtol=1e-5)

    # 2) Tiled-path check: exercises the cdiv grid with a partial edge block,
    #    the in-kernel row-chunk loop, and the lane-dense output path.
    key, kx2 = jax.random.split(key)
    batch2 = 300                      # not a multiple of the block size
    x2 = jax.random.normal(kx2, (batch2, input_size), jnp.float32)
    out2 = jax.block_until_ready(
        mlp_wad_forward(params, x2, block_m=256, chunk_rows=128))
    ref2 = mlp_wad_reference(params, x2)
    assert out2.shape == (batch2, output_size)
    assert jnp.allclose(out2, ref2, atol=1e-5, rtol=1e-5)

    print("KERNEL_OK")
</pallas_src>

<mosaic_0001>
module attributes {stable_mosaic.version = 11 : i64} {
  func.func @_fused_mlp_kernel(%arg0: i32, %arg1: memref<8x32xf32, #tpu.memory_space<vmem>>, %arg2: memref<32x64xf32, #tpu.memory_space<vmem>>, %arg3: memref<1x64xf32, #tpu.memory_space<vmem>>, %arg4: memref<64x32xf32, #tpu.memory_space<vmem>>, %arg5: memref<1x32xf32, #tpu.memory_space<vmem>>, %arg6: memref<1x32xf32, #tpu.memory_space<vmem>>, %arg7: memref<1x1xf32, #tpu.memory_space<vmem>>, %arg8: memref<1x1x8xf32, #tpu.memory_space<vmem>>) attributes {dimension_semantics = [#tpu.dimension_semantics<parallel>], iteration_bounds = array<i64: 1>, scalar_prefetch = 0 : i64, scratch_operands = 0 : i64, tpu.core_type = #tpu.core_type<tc>, window_params = [{transform_indices = @transform_0, window_bounds = array<i64: 8, 32>}, {pipeline_mode = #tpu.pipeline_mode<synchronous>, transform_indices = @transform_1, window_bounds = array<i64: 32, 64>}, {pipeline_mode = #tpu.pipeline_mode<synchronous>, transform_indices = @transform_2, window_bounds = array<i64: 1, 64>}, {pipeline_mode = #tpu.pipeline_mode<synchronous>, transform_indices = @transform_3, window_bounds = array<i64: 64, 32>}, {pipeline_mode = #tpu.pipeline_mode<synchronous>, transform_indices = @transform_4, window_bounds = array<i64: 1, 32>}, {pipeline_mode = #tpu.pipeline_mode<synchronous>, transform_indices = @transform_5, window_bounds = array<i64: 1, 32>}, {pipeline_mode = #tpu.pipeline_mode<synchronous>, transform_indices = @transform_6, window_bounds = array<i64: 1, 1>}, {transform_indices = @transform_7, window_bounds = array<i64: 1, 1, 8>}]} {
    %c0 = arith.constant 0 : index
    %c0_0 = arith.constant 0 : index
    %0 = vector.load %arg2[%c0, %c0_0] : memref<32x64xf32, #tpu.memory_space<vmem>>, vector<32x64xf32>
    %c0_1 = arith.constant 0 : index
    %c0_2 = arith.constant 0 : index
    %1 = vector.load %arg4[%c0_1, %c0_2] : memref<64x32xf32, #tpu.memory_space<vmem>>, vector<64x32xf32>
    %c0_3 = arith.constant 0 : index
    %c0_4 = arith.constant 0 : index
    %2 = vector.load %arg6[%c0_3, %c0_4] : memref<1x32xf32, #tpu.memory_space<vmem>>, vector<1x32xf32>
    %c0_5 = arith.constant 0 : index
    %c0_6 = arith.constant 0 : index
    %3 = vector.load %arg3[%c0_5, %c0_6] : memref<1x64xf32, #tpu.memory_space<vmem>>, vector<1x64xf32>
    %c0_7 = arith.constant 0 : index
    %c0_8 = arith.constant 0 : index
    %4 = vector.load %arg5[%c0_7, %c0_8] : memref<1x32xf32, #tpu.memory_space<vmem>>, vector<1x32xf32>
    %c0_9 = arith.constant 0 : index
    %c0_10 = arith.constant 0 : index
    %5 = vector.load %arg7[%c0_9, %c0_10] : memref<1x1xf32, #tpu.memory_space<vmem>>, vector<1x1xf32>
    %c0_11 = arith.constant 0 : index
    %c0_12 = arith.constant 0 : index
    %6 = vector.load %arg1[%c0_11, %c0_12] : memref<8x32xf32, #tpu.memory_space<vmem>>, vector<8x32xf32>
    %cst = arith.constant dense<0.000000e+00> : vector<8x64xf32>
    %7 = tpu.matmul %6, %0, %cst {dimension_numbers = #tpu.dot_dimension_numbers<[1], [0], [0], [1], [0, 0, 1, 1], [], []>} : vector<8x32xf32>, vector<32x64xf32>, vector<8x64xf32> -> vector<8x64xf32>
    %8 = vector.broadcast %3 : vector<1x64xf32> to vector<8x64xf32>
    %9 = arith.addf %7, %8 : vector<8x64xf32>
    %cst_13 = arith.constant 0.000000e+00 : f32
    %10 = vector.broadcast %cst_13 : f32 to vector<8x64xf32>
    %11 = arith.maximumf %9, %10 : vector<8x64xf32>
    %cst_14 = arith.constant dense<0.000000e+00> : vector<8x32xf32>
    %12 = tpu.matmul %11, %1, %cst_14 {dimension_numbers = #tpu.dot_dimension_numbers<[1], [0], [0], [1], [0, 0, 1, 1], [], []>} : vector<8x64xf32>, vector<64x32xf32>, vector<8x32xf32> -> vector<8x32xf32>
    %13 = vector.broadcast %4 : vector<1x32xf32> to vector<8x32xf32>
    %14 = arith.addf %12, %13 : vector<8x32xf32>
    %cst_15 = arith.constant 0.000000e+00 : f32
    %15 = vector.broadcast %cst_15 : f32 to vector<8x32xf32>
    %16 = arith.maximumf %14, %15 : vector<8x32xf32>
    %cst_16 = arith.constant dense<0.000000e+00> : vector<1x8xf32>
    %17 = tpu.matmul %2, %16, %cst_16 {dimension_numbers = #tpu.dot_dimension_numbers<[1], [1], [0], [0], [0, 0, 1, 0], [], []>} : vector<1x32xf32>, vector<8x32xf32>, vector<1x8xf32> -> vector<1x8xf32>
    %18 = vector.broadcast %5 : vector<1x1xf32> to vector<1x8xf32>
    %19 = arith.addf %17, %18 : vector<1x8xf32>
    %20 = arith.negf %19 : vector<1x8xf32>
    %21 = math.exp %20 : vector<1x8xf32>
    %cst_17 = arith.constant 1.000000e+00 : f32
    %22 = vector.broadcast %cst_17 : f32 to vector<1x8xf32>
    %23 = arith.addf %22, %21 : vector<1x8xf32>
    %24 = arith.divf %22, %23 : vector<1x8xf32>
    %c0_18 = arith.constant 0 : index
    %c0_19 = arith.constant 0 : index
    %c0_20 = arith.constant 0 : index
    %25 = vector.load %arg8[%c0_18, %c0_19, %c0_20] : memref<1x1x8xf32, #tpu.memory_space<vmem>>, vector<1x1x8xf32>
    %26 = vector.shape_cast %25 : vector<1x1x8xf32> to vector<1x8xf32>
    %27 = vector.shape_cast %24 : vector<1x8xf32> to vector<1x1x8xf32>
    tpu.vector_store %arg8[%c0_18, %c0_19, %c0_20], %27 {strides = array<i32>} : memref<1x1x8xf32, #tpu.memory_space<vmem>>, vector<1x1x8xf32>,
    return
  }
  func.func @transform_0(%arg0: i32) -> (i32, i32) {
    %c0_i32 = arith.constant 0 : i32
    %c0_i32_0 = arith.constant 0 : i32
    return %arg0, %c0_i32 : i32, i32
  }
  func.func @transform_1(%arg0: i32) -> (i32, i32) {
    %c0_i32 = arith.constant 0 : i32
    %c0_i32_0 = arith.constant 0 : i32
    %c0_i32_1 = arith.constant 0 : i32
    return %c0_i32, %c0_i32_0 : i32, i32
  }
  func.func @transform_2(%arg0: i32) -> (i32, i32) {
    %c0_i32 = arith.constant 0 : i32
    %c0_i32_0 = arith.constant 0 : i32
    %c0_i32_1 = arith.constant 0 : i32
    return %c0_i32, %c0_i32_0 : i32, i32
  }
  func.func @transform_3(%arg0: i32) -> (i32, i32) {
    %c0_i32 = arith.constant 0 : i32
    %c0_i32_0 = arith.constant 0 : i32
    %c0_i32_1 = arith.constant 0 : i32
    return %c0_i32, %c0_i32_0 : i32, i32
  }
  func.func @transform_4(%arg0: i32) -> (i32, i32) {
    %c0_i32 = arith.constant 0 : i32
    %c0_i32_0 = arith.constant 0 : i32
    %c0_i32_1 = arith.constant 0 : i32
    return %c0_i32, %c0_i32_0 : i32, i32
  }
  func.func @transform_5(%arg0: i32) -> (i32, i32) {
    %c0_i32 = arith.constant 0 : i32
    %c0_i32_0 = arith.constant 0 : i32
    %c0_i32_1 = arith.constant 0 : i32
    return %c0_i32, %c0_i32_0 : i32, i32
  }
  func.func @transform_6(%arg0: i32) -> (i32, i32) {
    %c0_i32 = arith.constant 0 : i32
    %c0_i32_0 = arith.constant 0 : i32
    %c0_i32_1 = arith.constant 0 : i32
    return %c0_i32, %c0_i32_0 : i32, i32
  }
  func.func @transform_7(%arg0: i32) -> (i32, i32, i32) {
    %c0_i32 = arith.constant 0 : i32
    %c0_i32_0 = arith.constant 0 : i32
    %c0_i32_1 = arith.constant 0 : i32
    return %arg0, %c0_i32, %c0_i32_0 : i32, i32, i32
  }
}

</mosaic_0001>

<bundles_post_ra>
// kernel: tpu_custom_call.1
= control target key start
LH: loop header
LB: loop body
LE: loop exit
PB: predicated region body
PF: predicated region fallthrough
CT: control target
= control target key end

     0   :  { %s539_s0 = inlined_call_operand.vmem [shape: f32[8,32], index: 0, kind: input, shape index: {}]   ;;  %s540_s1 = inlined_call_operand.vmem [shape: f32[32,64], index: 1, kind: input, shape index: {}]   ;;  %s541_s2 = inlined_call_operand.vmem [shape: f32[1,64], index: 2, kind: input, shape index: {}]   ;;  %s542_s3 = inlined_call_operand.vmem [shape: f32[64,32], index: 3, kind: input, shape index: {}]   ;;  %s543_s4 = inlined_call_operand.vmem [shape: f32[1,32], index: 4, kind: input, shape index: {}]   ;;  %s544_s5 = inlined_call_operand.vmem [shape: f32[1,32], index: 5, kind: input, shape index: {}]   ;;  %s545_s6 = inlined_call_operand.<no memory space> [shape: f32[1,1], index: 6, kind: input, shape index: {}]   ;;  %s546_s7 = inlined_call_operand.hbm [shape: f32[1,1,8], index: 7, kind: output, shape index: {}]  }
   0x1   :  { %v12_v0 = vstv %s545_s6 }
   0x2   :  { %13 = vst [vmem:[#allocation2] sm:$0x1] %v12_v0 }
   0x3   :  { %v29_v1 = vld [vmem:[%s540_s1] sm:$0xff]  ;;  %v30_v2 = vld [vmem:[%s540_s1 + $0x8] sm:$0xff]  ;;  %v31_v3 = vld [vmem:[%s540_s1 + $0x10] sm:$0xff]  ;;  %v425_v4 = vmov 0.0|0.0   ;;  %vm426_vm0 = vmmov 0   ;;  %v427_v7 = vmov 0.0  }
   0x4   :  { %373 = vmatprep.subr.bf16.mxu0 %v425_v4  ;;  %v374_v5 = vpack.c.bf16 %v30_v2, %v29_v1  ;;  %v32_v6 = vld [vmem:[%s540_s1 + $0x18] sm:$0xff]  ;;  %346 = vmatprep.mubr.msk.f32.mxu0 %vm426_vm0, %v427_v7  ;;  %v33_v8 = vld [vmem:[%s542_s3] sm:$0xff]  ;;  %v34_v9 = vld [vmem:[%s542_s3 + $0x8] sm:$0xff] }
   0x5   :  { %379 = vmatprep.subr.bf16.mxu1 %v425_v4  ;;  %v35_v10 = vld [vmem:[%s542_s3 + $0x10] sm:$0xff]  ;;  %v36_v11 = vld [vmem:[%s542_s3 + $0x18] sm:$0xff]  ;;  %365 = vmatprep.mubr.msk.f32.mxu1 %vm426_vm0, %v427_v7  ;;  %v377_v12 = vpack.c.bf16 %v32_v6, %v31_v3  ;;  %v380_v13 = vpack.c.bf16 %v34_v9, %v33_v8 }
   0x6   :  { %375 = vmatpush3.bf16.msra.mxu0 %v374_v5 }
   0x7   :  { %376 = vmatprep.subr.bf16.mxu0 %v425_v4 }
   0x8   :  { %14 = vsyncpa [#allocation4], 0  ;;  %381 = vmatpush3.bf16.msra.mxu1 %v380_v13  ;;  %v383_v14 = vpack.c.bf16 %v36_v11, %v35_v10  ;;  %v37_v15 = vld [vmem:[%s542_s3 + $0x20] sm:$0xff]  ;;  %v38_v16 = vld [vmem:[%s542_s3 + $0x28] sm:$0xff]  ;;  %vm52_vm1 = vcmask 261120   ;;  %vm133_vm2 = vcmask 523264   ;;  %v213_v35 = vlaneseq }
   0x9   :  { %382 = vmatprep.subr.bf16.mxu1 %v425_v4  ;;  %v45_v17 = vld [vmem:[%s539_s0] sm:$0xff]  ;;  %v386_v18 = vpack.c.bf16 %v38_v16, %v37_v15  ;;  %v39_v19 = vld [vmem:[%s542_s3 + $0x30] sm:$0xff]  ;;  %v40_v20 = vld [vmem:[%s542_s3 + $0x38] sm:$0xff]  ;;  %v428_v28 = vmov 0   ;;  %vm299_vm3 = vcmask 57344  }
   0xa   :  { %378 = vmatpush3.bf16.msra.mxu0 %v377_v12  ;;  %v389_v21 = vpack.c.bf16 %v40_v20, %v39_v19  ;;  %v315_v22 = vld [vmem:[%s541_s2] ss:$0 sm:$0xff]  ;;  %396 = vset.pattern.permute.xlu0 %v428_v28  ;;  %v214_v36 = vshrl.u32 %v213_v35, 7 }
   0xb   :  { %368 = vmatprep.subr.mxu0 %v427_v7  ;;  %v44_v27 = vld [vmem:[#allocation2] sm:$0x1] }
   0xc   :  { %384 = vmatpush3.bf16.msra.mxu1 %v383_v14  ;;  %210 = vperm.xlu0 %396, %v44_v27   ;;  %v317_v29 = vld [vmem:[%s543_s4] ss:$0 sm:$0xff]  ;;  %v215_v37 = vsub.s32 0, %v214_v36  ;;  %s429_s4 = smov [#allocation3]  }
   0xd   :  { %347 = vmatmul.mubr.msk.f32.vlgmr.msra.gmra.mrb[0].mxu0 %vm52_vm1, %v45_v17  ;;  %385 = vmatprep.subr.bf16.mxu1 %v425_v4  ;;  %v41_v34 = vld [vmem:[%s544_s5] sm:$0x1]  ;;  %s307_s30 = sshll.u32 %s429_s4, 4  ;;  %s308_s30 = int_to_ptr.vmem [resolvable:$true] %s307_s30 }
   0xe   :  { %370 = vmatprep.mubr.msk.f32.mxu0 %vm426_vm0, %v427_v7  ;;  %s401_s5 = scalar_lea.vmem %s308_s30, 16  ;;  %s405_s8 = scalar_lea.vmem %s308_s30, 32 }
   0xf   :  { %p402_p0 = scmp.ne.s32.totalorder %s308_s30, %s401_s5  ;;  %p406_p1 = scmp.lt.s32.totalorder %s308_s30, %s308_s30 }
  0x10   :  { %387 = vmatpush3.bf16.msra.mxu1 %v386_v18  ;;  %p407_p2 = scmp.lt.s32.totalorder %s405_s8, %s401_s5 }
  0x11   :  { %388 = vmatprep.subr.bf16.mxu1 %v425_v4 }
  0x12   :  { %p408_p3 = por %p407_p2, %p406_p1 }
  0x14   :  { %390 = vmatpush3.bf16.msra.mxu1 %v389_v21  ;;  %p409_p4 = pnand %p408_p3, %p402_p0 }
  0x8b   :  { %v211_v38 = vpop.permute.xlu0 %210 }
  0x8c   :  { %v216_v39 = vrot.slane %v211_v38, %v215_v37 }
  0xe0   :  { %v122_v23 = vpop.f32.mrb[0].mxu0 }
  0xe1   :  { %v123_v24 = vadd.f32 %v315_v22, %v122_v23  ;;  %v348_v25 = vpop.f32.mrb[1].mxu0 }
  0xe3   :  { %v126_v26 = vmax.f32 %v123_v24, 0.0 }
  0xe5   :  { %366 = vmatmul.mubr.msk.f32.vlgmr.msra.gmra.mrb[0].mxu1 %vm133_vm2, %v126_v26 }
 0x1b8   :  { %v203_v30 = vpop.f32.mrb[0].mxu1 }
 0x1b9   :  { %v204_v31 = vadd.f32 %v317_v29, %v203_v30  ;;  %v367_v32 = vpop.f32.mrb[1].mxu1 }
 0x1bb   :  { %v207_v33 = vmax.f32 %v204_v31, 0.0 }
 0x1bd   :  { %369 = vmatpush3.xpose.msk.msra.mxu0 %vm52_vm1, %v207_v33 }
 0x1c0   :  { %371 = vmatmul.mubr.msk.f32.vlgmr.msra.gmra.mrb[2].mxu0 %vm52_vm1, %v41_v34 }
 0x293   :  { %v289_v40 = vpop.f32.mrb[2].mxu0 }
 0x294   :  { %v290_v41 = vadd.f32 %v289_v40, %v216_v39  ;;  %v372_v42 = vpop.f32.mrb[3].mxu0 }
 0x296   :  { %v321_v43 = vmul.f32 -1.442695, %v290_v41 }
 0x298   :  { %397 = vpow2.f32 %v321_v43 }
 0x2a2   :  { %v398_v44 = vpop.eup %397 }
 0x2a3   :  { %v296_v45 = vadd.f32 1.0, %v398_v44 }
 0x2a5   :  { %399 = vrcp.f32 %v296_v45 }
 0x2af   :  { %v400_v46 = vpop.eup %399 }
 0x2b0   :  { %300 = vst.msk [vmem:[#allocation3] sm:$0x1] %vm299_vm3, %v400_v46 }
 0x2b1   :  { %412 = shalt.err (!%p409_p4)
}
 0x2b2   :  { %s413_s6 = scalar_lea.hbm %s546_s7, 16 }
 0x2b3   :  { %p414_p5 = scmp.ne.s32.totalorder %s546_s7, %s413_s6  ;;  %p417_p6 = scmp.lt.u32.totalorder %s413_s6, %s546_s7 }
 0x2b5   :  { %p419_p7 = pnand %p417_p6, %p414_p5 }
 0x2b7   :  { %422 = shalt.err (!%p419_p7)
}
 0x2b8   :  { %310 = dma.vmem_to_hbm [thread:$0]  %s308_s30, 16, %s546_s7, [#allocation4]  }
 0x2b9   :  { %423 = dma.done.wait [#allocation4], 16  }
 0x2ba   :  { %424 = vsyncadd [#allocation4], 4294967280 }
 0x2bb   :  { %314 = vsyncpa [#allocation4], 1 }

</bundles_post_ra>
